<compile_context>
chip_gen: v5e
topology: v5e:2x2
jax: 0.10.0
libtpu: 0.0.40
codegen_flags: <defaults>
</compile_context>

<pallas_src>
import functools

import jax
import jax.numpy as jnp
from jax.experimental import pallas as pl
from jax.experimental.pallas import tpu as pltpu


def _round_up(n, m):
    return ((n + m - 1) // m) * m


def _fused_mlp_kernel(x_ref, w_ref, b_ref, o_ref, *, num_layers, d_in, out_pad):
    """Fused [Linear -> Tanh]* -> Linear, all layers in one kernel.

    x_ref: (B, d_in)            activations (d_in is a multiple of 8)
    w_ref: (L, D, D)            packed, zero-padded weights ([in, out] layout)
    b_ref: (L, 1, D)            packed, zero-padded biases
    o_ref: (B, out_pad)         lane-dense padded output (out_pad % 128 == 0)

    Intermediate activations stay in vregs/VMEM; each matmul hits the MXU
    with f32 accumulation; tanh lowers to the EUP slot.
    """
    h = x_ref[...]
    for i in range(num_layers):
        # First layer only consumes the real input rows; later layers use the
        # full lane-dense 128-wide weight tile (padded rows/cols are zero).
        w = w_ref[i, :d_in, :] if i == 0 else w_ref[i]
        y = jnp.dot(h, w, preferred_element_type=jnp.float32) + b_ref[i]
        h = jnp.tanh(y) if i < num_layers - 1 else y
    o_ref[...] = h[:, :out_pad].astype(o_ref.dtype)


def init_params(key, input_size, hidden_sizes, output_size):
    """Deterministic PyTorch-Linear-style init (uniform(-1/sqrt(fan_in), +))."""
    params = []
    sizes = [input_size] + list(hidden_sizes) + [output_size]
    for i in range(len(sizes) - 1):
        fan_in, fan_out = sizes[i], sizes[i + 1]
        key, kw, kb = jax.random.split(key, 3)
        bound = 1.0 / jnp.sqrt(jnp.float32(fan_in))
        # stored as [in, out] so the kernel does x @ W
        w = jax.random.uniform(kw, (fan_in, fan_out), jnp.float32, -bound, bound)
        b = jax.random.uniform(kb, (1, fan_out), jnp.float32, -bound, bound)
        params.append((w, b))
    return params


def prepare_params(params):
    """One-time prep: zero-pad every layer to a lane-dense width and pack.

    Returns (w_packed (L,D,D), b_packed (L,1,D), d_in, out_size, d_max) where
    D = d_max is the common padded width (>=128, multiple of 128).
    Done once at init, so no per-forward pad/pack ops remain.
    """
    d_in = params[0][0].shape[0]
    out_size = params[-1][0].shape[1]
    all_dims = [d_in] + [w.shape[1] for w, _ in params]
    d_max = _round_up(max(max(all_dims), 128), 128)
    num_layers = len(params)

    w_packed = jnp.zeros((num_layers, d_max, d_max), jnp.float32)
    b_packed = jnp.zeros((num_layers, 1, d_max), jnp.float32)
    for i, (w, b) in enumerate(params):
        w_packed = w_packed.at[i, : w.shape[0], : w.shape[1]].set(w)
        b_packed = b_packed.at[i, :, : b.shape[1]].set(b.reshape(1, -1))
    return w_packed, b_packed, d_in, out_size, d_max


def model2_forward(prepared, x, output_activation=None):
    """Forward pass matching Model2.forward: tanh on hidden layers, none on final."""
    w_packed, b_packed, d_in, out_size, d_max = prepared
    num_layers = w_packed.shape[0]
    B = x.shape[0]

    # Keep the sliced weight rows sublane-aligned; no-op when d_in % 8 == 0.
    d_in_pad = _round_up(d_in, 8)
    if x.shape[1] != d_in_pad:
        x = jnp.pad(x, ((0, 0), (0, d_in_pad - x.shape[1])))

    # Lane-dense output width: exactly 128 (never rounded further up).
    out_pad = min(_round_up(max(out_size, 128), 128), d_max)

    flops = 2 * B * d_in_pad * d_max + 2 * B * d_max * d_max * (num_layers - 1)
    transcendentals = B * d_max * (num_layers - 1)
    bytes_accessed = 4 * (x.size + w_packed.size + b_packed.size + B * out_pad)

    vmem = pl.BlockSpec(memory_space=pltpu.MemorySpace.VMEM)
    out_padded = pl.pallas_call(
        functools.partial(
            _fused_mlp_kernel,
            num_layers=num_layers,
            d_in=d_in_pad,
            out_pad=out_pad,
        ),
        out_shape=jax.ShapeDtypeStruct((B, out_pad), jnp.float32),
        in_specs=[vmem, vmem, vmem],
        out_specs=vmem,
        cost_estimate=pl.CostEstimate(
            flops=flops,
            transcendentals=transcendentals,
            bytes_accessed=bytes_accessed,
        ),
    )(x, w_packed, b_packed)

    # If the consumer can read column 0 of the padded output directly, this
    # slice can be dropped / fused into the consumer.
    out = out_padded[:, :out_size]
    if output_activation is not None:
        out = output_activation(out)  # default None, matching the PyTorch module
    return out


if __name__ == "__main__":
    # Small PPO-value-net-like shapes: obs_dim=32, hidden=(64, 64), value output=1.
    batch = 8
    input_size = 32
    hidden_sizes = (64, 64)
    output_size = 1

    key = jax.random.PRNGKey(0)
    kx, kp = jax.random.split(key)
    x = jax.random.normal(kx, (batch, input_size), dtype=jnp.float32)
    params = init_params(kp, input_size, hidden_sizes, output_size)

    prepared = prepare_params(params)  # one-time pad + pack (not per forward)
    out = model2_forward(prepared, x)
    jax.block_until_ready(out)

    # Sanity check against plain JAX reference using the ORIGINAL (unpadded) params.
    ref = x
    for w, b in params[:-1]:
        ref = jnp.tanh(ref @ w + b)
    ref = ref @ params[-1][0] + params[-1][1]
    assert out.shape == (batch, output_size)
    assert jnp.allclose(out, ref, atol=1e-5, rtol=1e-5)

    print("KERNEL_OK")
</pallas_src>

<mosaic_0001>
module attributes {stable_mosaic.version = 11 : i64} {
  func.func @_fused_mlp_kernel(%arg0: memref<8x32xf32, #tpu.memory_space<vmem>>, %arg1: memref<3x128x128xf32, #tpu.memory_space<vmem>>, %arg2: memref<3x1x128xf32, #tpu.memory_space<vmem>>, %arg3: memref<8x128xf32, #tpu.memory_space<vmem>>) attributes {dimension_semantics = [], scalar_prefetch = 0 : i64, scratch_operands = 0 : i64, tpu.core_type = #tpu.core_type<tc>} {
    %c0 = arith.constant 0 : index
    %c0_0 = arith.constant 0 : index
    %0 = vector.load %arg0[%c0, %c0_0] : memref<8x32xf32, #tpu.memory_space<vmem>>, vector<8x32xf32>
    %c0_1 = arith.constant 0 : index
    %c0_2 = arith.constant 0 : index
    %c0_3 = arith.constant 0 : index
    %1 = vector.load %arg1[%c0_1, %c0_2, %c0_3] : memref<3x128x128xf32, #tpu.memory_space<vmem>>, vector<1x32x128xf32>
    %2 = vector.shape_cast %1 : vector<1x32x128xf32> to vector<32x128xf32>
    %cst = arith.constant dense<0.000000e+00> : vector<8x128xf32>
    %3 = tpu.matmul %0, %2, %cst {dimension_numbers = #tpu.dot_dimension_numbers<[1], [0], [0], [1], [0, 0, 1, 1], [], []>} : vector<8x32xf32>, vector<32x128xf32>, vector<8x128xf32> -> vector<8x128xf32>
    %c0_4 = arith.constant 0 : index
    %c0_5 = arith.constant 0 : index
    %c0_6 = arith.constant 0 : index
    %4 = vector.load %arg2[%c0_4, %c0_5, %c0_6] : memref<3x1x128xf32, #tpu.memory_space<vmem>>, vector<1x1x128xf32>
    %5 = vector.shape_cast %4 : vector<1x1x128xf32> to vector<1x128xf32>
    %6 = vector.broadcast %5 : vector<1x128xf32> to vector<8x128xf32>
    %7 = arith.addf %3, %6 : vector<8x128xf32>
    %8 = math.tanh %7 : vector<8x128xf32>
    %c1 = arith.constant 1 : index
    %c0_7 = arith.constant 0 : index
    %c0_8 = arith.constant 0 : index
    %9 = vector.load %arg1[%c1, %c0_7, %c0_8] : memref<3x128x128xf32, #tpu.memory_space<vmem>>, vector<1x128x128xf32>
    %10 = vector.shape_cast %9 : vector<1x128x128xf32> to vector<128x128xf32>
    %cst_9 = arith.constant dense<0.000000e+00> : vector<8x128xf32>
    %11 = tpu.matmul %8, %10, %cst_9 {dimension_numbers = #tpu.dot_dimension_numbers<[1], [0], [0], [1], [0, 0, 1, 1], [], []>} : vector<8x128xf32>, vector<128x128xf32>, vector<8x128xf32> -> vector<8x128xf32>
    %c1_10 = arith.constant 1 : index
    %c0_11 = arith.constant 0 : index
    %c0_12 = arith.constant 0 : index
    %12 = vector.load %arg2[%c1_10, %c0_11, %c0_12] : memref<3x1x128xf32, #tpu.memory_space<vmem>>, vector<1x1x128xf32>
    %13 = vector.shape_cast %12 : vector<1x1x128xf32> to vector<1x128xf32>
    %14 = vector.broadcast %13 : vector<1x128xf32> to vector<8x128xf32>
    %15 = arith.addf %11, %14 : vector<8x128xf32>
    %16 = math.tanh %15 : vector<8x128xf32>
    %c2 = arith.constant 2 : index
    %c0_13 = arith.constant 0 : index
    %c0_14 = arith.constant 0 : index
    %17 = vector.load %arg1[%c2, %c0_13, %c0_14] : memref<3x128x128xf32, #tpu.memory_space<vmem>>, vector<1x128x128xf32>
    %18 = vector.shape_cast %17 : vector<1x128x128xf32> to vector<128x128xf32>
    %cst_15 = arith.constant dense<0.000000e+00> : vector<8x128xf32>
    %19 = tpu.matmul %16, %18, %cst_15 {dimension_numbers = #tpu.dot_dimension_numbers<[1], [0], [0], [1], [0, 0, 1, 1], [], []>} : vector<8x128xf32>, vector<128x128xf32>, vector<8x128xf32> -> vector<8x128xf32>
    %c2_16 = arith.constant 2 : index
    %c0_17 = arith.constant 0 : index
    %c0_18 = arith.constant 0 : index
    %20 = vector.load %arg2[%c2_16, %c0_17, %c0_18] : memref<3x1x128xf32, #tpu.memory_space<vmem>>, vector<1x1x128xf32>
    %21 = vector.shape_cast %20 : vector<1x1x128xf32> to vector<1x128xf32>
    %22 = vector.broadcast %21 : vector<1x128xf32> to vector<8x128xf32>
    %23 = arith.addf %19, %22 : vector<8x128xf32>
    %c0_19 = arith.constant 0 : index
    %c0_20 = arith.constant 0 : index
    %24 = vector.load %arg3[%c0_19, %c0_20] : memref<8x128xf32, #tpu.memory_space<vmem>>, vector<8x128xf32>
    tpu.vector_store %arg3[%c0_19, %c0_20], %23 {strides = array<i32>} : memref<8x128xf32, #tpu.memory_space<vmem>>, vector<8x128xf32>,
    return
  }
}

</mosaic_0001>

<bundles_post_ra>
// kernel: tpu_custom_call.1
= control target key start
LH: loop header
LB: loop body
LE: loop exit
PB: predicated region body
PF: predicated region fallthrough
CT: control target
= control target key end

     0   :  { %8 = vsyncpa [#allocation3], 0  ;;  %s356_s0 = inlined_call_operand.hbm [shape: f32[8,32], index: 0, kind: input, shape index: {}]   ;;  %s357_s1 = inlined_call_operand.hbm [shape: f32[3,128,128], index: 1, kind: input, shape index: {}]   ;;  %s358_s2 = inlined_call_operand.hbm [shape: f32[3,1,128], index: 2, kind: input, shape index: {}]   ;;  %s359_s3 = inlined_call_operand.hbm [shape: f32[8,128], index: 3, kind: output, shape index: {}]  }
   0x1   :  { %9 = vsyncpa [#allocation6], 0  ;;  %s26_s14 = sshll.u32 %s357_s1, 4  ;;  %s27_s14 = int_to_ptr.hbm [resolvable:$true] %s26_s14 }
   0x2   :  { %10 = vsyncpa [#allocation4], 0  ;;  %s316_s15 = smov [#allocation5]   ;;  %s16_s19 = sshll.u32 %s356_s0, 4  ;;  %s17_s19 = int_to_ptr.hbm [resolvable:$true] %s16_s19 }
   0x3   :  { %s28_s16 = sshll.u32 %s316_s15, 4  ;;  %s317_s20 = smov 128   ;;  %s29_s16 = int_to_ptr.vmem [resolvable:$true] %s28_s16 }
   0x4   :  { %s318_s21 = smov 8   ;;  %s319_s22 = smov [#allocation2]  }
   0x5   :  { %34 = dma.hbm_to_vmem [thread:$0]  %s27_s14, 6144, %s29_s16, [#allocation6], %s317_s20, %s317_s20, %s318_s21  }
   0x6   :  { %s18_s23 = sshll.u32 %s319_s22, 4  ;;  %s39_s26 = sshll.u32 %s358_s2, 4  ;;  %s19_s23 = int_to_ptr.vmem [resolvable:$true] %s18_s23  ;;  %s40_s26 = int_to_ptr.hbm [resolvable:$true] %s39_s26 }
   0x7   :  { %21 = dma.hbm_to_vmem [thread:$0]  %s17_s19, 128, %s19_s23, [#allocation3]  }
   0x8   :  { %s320_s1 = smov [#allocation7]   ;;  %s321_s28 = smov 16  }
   0x9   :  { %s41_s27 = sshll.u32 %s320_s1, 4  ;;  %s322_s29 = smov 1   ;;  %s42_s27 = int_to_ptr.vmem [resolvable:$true] %s41_s27 }
   0xa   :  { %47 = dma.hbm_to_vmem [thread:$0]  %s40_s26, 48, %s42_s27, [#allocation6], %s321_s28, %s321_s28, %s322_s29  }
   0xb   :  { %310 = dma.done.wait [#allocation3], 128  }
   0xc   :  { %311 = vsyncadd [#allocation3], 4294967168 }
   0xd   :  { %312 = dma.done.wait [#allocation6], 6192  }
   0xe   :  { %313 = vsyncadd [#allocation6], 4294961104  ;;  %v64_v0 = vld [vmem:[#allocation5 + $0x18] sm:$0xff]  ;;  %v63_v1 = vld [vmem:[#allocation5 + $0x10] sm:$0xff]  ;;  %vm69_vm0 = vcmask 261120   ;;  %s323_s0 = smov [#allocation8]  }
   0xf   :  { %85 = vmatpush.msra.mxu0 %v64_v0  ;;  %v110_v2 = vld [vmem:[#allocation5 + $0xf8] sm:$0xff]  ;;  %v62_v3 = vld [vmem:[#allocation5 + $0x8] sm:$0xff]  ;;  %v109_v4 = vld [vmem:[#allocation5 + $0xf0] sm:$0xff]  ;;  %s185_s2 = sshll.u32 %s323_s0, 4  ;;  %s187_s5 = sshll.u32 %s359_s3, 4  ;;  %s186_s2 = int_to_ptr.vmem [resolvable:$true] %s185_s2  ;;  %s188_s5 = int_to_ptr.hbm [resolvable:$true] %s187_s5 }
  0x10   :  { %116 = vmatpush.msra.mxu1 %v110_v2  ;;  %v108_v5 = vld [vmem:[#allocation5 + $0xe8] sm:$0xff]  ;;  %v61_v6 = vld [vmem:[#allocation5] sm:$0xff]  ;;  %v60_v7 = vld [vmem:[#allocation2] sm:$0xff] }
  0x11   :  { %86 = vmatpush.msra.mxu0 %v63_v1  ;;  %v107_v8 = vld [vmem:[#allocation5 + $0xe0] sm:$0xff]  ;;  %v106_v9 = vld [vmem:[#allocation5 + $0xd8] sm:$0xff]  ;;  %v105_v10 = vld [vmem:[#allocation5 + $0xd0] sm:$0xff] }
  0x12   :  { %117 = vmatpush.msra.mxu1 %v109_v4  ;;  %v104_v11 = vld [vmem:[#allocation5 + $0xc8] sm:$0xff]  ;;  %v103_v12 = vld [vmem:[#allocation5 + $0xc0] sm:$0xff]  ;;  %v102_v13 = vld [vmem:[#allocation5 + $0xb8] sm:$0xff] }
  0x13   :  { %87 = vmatpush.msra.mxu0 %v62_v3  ;;  %v101_v14 = vld [vmem:[#allocation5 + $0xb0] sm:$0xff]  ;;  %v100_v15 = vld [vmem:[#allocation5 + $0xa8] sm:$0xff]  ;;  %v99_v16 = vld [vmem:[#allocation5 + $0xa0] sm:$0xff] }
  0x14   :  { %118 = vmatpush.msra.mxu1 %v108_v5  ;;  %v98_v17 = vld [vmem:[#allocation5 + $0x98] sm:$0xff]  ;;  %v97_v18 = vld [vmem:[#allocation5 + $0x90] sm:$0xff]  ;;  %v96_v19 = vld [vmem:[#allocation5 + $0x88] sm:$0xff] }
  0x15   :  { %88 = vmatpush.msra.mxu0 %v61_v6  ;;  %v95_v20 = vld [vmem:[#allocation5 + $0x80] sm:$0xff]  ;;  %v153_v21 = vld [vmem:[#allocation5 + $0x178] sm:$0xff]  ;;  %v152_v22 = vld [vmem:[#allocation5 + $0x170] sm:$0xff] }
  0x16   :  { %198 = vmatmul.msk.f32.vlgmr.msra.gmra.mxu0 %vm69_vm0, %v60_v7  ;;  %119 = vmatpush.msra.mxu1 %v107_v8  ;;  %v151_v23 = vld [vmem:[#allocation5 + $0x168] sm:$0xff]  ;;  %v150_v24 = vld [vmem:[#allocation5 + $0x160] sm:$0xff]  ;;  %v149_v25 = vld [vmem:[#allocation5 + $0x158] sm:$0xff] }
  0x17   :  { %159 = vmatpush.msra.mxu2 %v153_v21  ;;  %v148_v26 = vld [vmem:[#allocation5 + $0x150] sm:$0xff]  ;;  %v147_v27 = vld [vmem:[#allocation5 + $0x148] sm:$0xff]  ;;  %v146_v28 = vld [vmem:[#allocation5 + $0x140] sm:$0xff] }
  0x18   :  { %120 = vmatpush.msra.mxu1 %v106_v9  ;;  %v145_v29 = vld [vmem:[#allocation5 + $0x138] sm:$0xff]  ;;  %v144_v30 = vld [vmem:[#allocation5 + $0x130] sm:$0xff]  ;;  %v143_v31 = vld [vmem:[#allocation5 + $0x128] sm:$0xff] }
  0x19   :  { %160 = vmatpush.msra.mxu2 %v152_v22  ;;  %v207_v32 = vld [vmem:[#allocation7] ss:$0 sm:$0xff]  ;;  %v141_v37 = vld [vmem:[#allocation5 + $0x118] sm:$0xff]  ;;  %v140_v38 = vld [vmem:[#allocation5 + $0x110] sm:$0xff] }
  0x1a   :  { %121 = vmatpush.msra.mxu1 %v105_v10  ;;  %v142_v36 = vld [vmem:[#allocation5 + $0x120] sm:$0xff]  ;;  %v139_v39 = vld [vmem:[#allocation5 + $0x108] sm:$0xff] }
  0x1b   :  { %161 = vmatpush.msra.mxu2 %v151_v23  ;;  %v138_v40 = vld [vmem:[#allocation5 + $0x100] sm:$0xff] }
  0x1c   :  { %122 = vmatpush.msra.mxu1 %v104_v11  ;;  %v208_v41 = vld [vmem:[#allocation7 + $0x1] ss:$0 sm:$0xff]  ;;  %v209_v45 = vld [vmem:[#allocation7 + $0x2] ss:$0 sm:$0xff] }
  0x1d   :  { %162 = vmatpush.msra.mxu2 %v150_v24 }
  0x1e   :  { %123 = vmatpush.msra.mxu1 %v103_v12 }
  0x1f   :  { %163 = vmatpush.msra.mxu2 %v149_v25 }
  0x20   :  { %124 = vmatpush.msra.mxu1 %v102_v13 }
  0x21   :  { %164 = vmatpush.msra.mxu2 %v148_v26 }
  0x22   :  { %125 = vmatpush.msra.mxu1 %v101_v14 }
  0x23   :  { %165 = vmatpush.msra.mxu2 %v147_v27 }
  0x24   :  { %126 = vmatpush.msra.mxu1 %v100_v15 }
  0x25   :  { %166 = vmatpush.msra.mxu2 %v146_v28 }
  0x26   :  { %127 = vmatpush.msra.mxu1 %v99_v16 }
  0x27   :  { %167 = vmatpush.msra.mxu2 %v145_v29 }
  0x28   :  { %128 = vmatpush.msra.mxu1 %v98_v17 }
  0x29   :  { %168 = vmatpush.msra.mxu2 %v144_v30 }
  0x2a   :  { %129 = vmatpush.msra.mxu1 %v97_v18 }
  0x2b   :  { %169 = vmatpush.msra.mxu2 %v143_v31 }
  0x2c   :  { %130 = vmatpush.msra.mxu1 %v96_v19 }
  0x2d   :  { %170 = vmatpush.msra.mxu2 %v142_v36 }
  0x2e   :  { %131 = vmatpush.msra.mxu1 %v95_v20 }
  0x2f   :  { %171 = vmatpush.msra.mxu2 %v141_v37 }
  0x31   :  { %172 = vmatpush.msra.mxu2 %v140_v38 }
  0x33   :  { %173 = vmatpush.msra.mxu2 %v139_v39 }
  0x35   :  { %174 = vmatpush.msra.mxu2 %v138_v40 }
  0x93   :  { %v90_v33 = vpop.f32.mrf.mxu0 }
  0x94   :  { %v91_v34 = vadd.f32 %v207_v32, %v90_v33 }
  0x96   :  { %210 = vtanh.f32 %v91_v34 }
  0x9c   :  { %v211_v35 = vpop.eup %210 }
  0x9d   :  { %132 = vmatmul.f32.vlgmr.msra.gmra.mxu1 %v211_v35 }
 0x11a   :  { %v133_v42 = vpop.f32.mrf.mxu1 }
 0x11b   :  { %v134_v43 = vadd.f32 %v208_v41, %v133_v42 }
 0x11d   :  { %212 = vtanh.f32 %v134_v43 }
 0x123   :  { %v213_v44 = vpop.eup %212 }
 0x124   :  { %175 = vmatmul.f32.vlgmr.msra.gmra.mxu2 %v213_v44 }
 0x1a7   :  { %v176_v46 = vpop.f32.mrf.mxu2 }
 0x1a8   :  { %v177_v47 = vadd.f32 %v209_v45, %v176_v46 }
 0x1aa   :  { %179 = vst [vmem:[#allocation8] sm:$0xff] %v177_v47 }
 0x1ab   :  { %190 = dma.vmem_to_hbm [thread:$0]  %s186_s2, 128, %s188_s5, [#allocation4]  }
 0x1ac   :  { %314 = dma.done.wait [#allocation4], 128  }
 0x1ad   :  { %315 = vsyncadd [#allocation4], 4294967168 }
 0x1ae   :  { %195 = vsyncpa [#allocation3], 1 }
 0x1af   :  { %196 = vsyncpa [#allocation6], 1 }
 0x1b0   :  { %197 = vsyncpa [#allocation4], 1 }

</bundles_post_ra>
